<compile_context>
chip_gen: v6e
topology: v6e:2x2x1
jax: 0.10.0
libtpu: 0.0.40
codegen_flags: <defaults>
</compile_context>

<pallas_src>
import functools

import jax
import jax.numpy as jnp
from jax import lax
from jax.experimental import pallas as pl
from jax.experimental.pallas import tpu as pltpu


def _round_up(x, m):
    return ((x + m - 1) // m) * m


def _rnd_kernel(x_ref, w1_ref, w2_ref, params_ref, o_ref, *, eps):
    """One (TB, in_size) x-tile -> one (TB, units) output tile; fused MLP + LayerNorm."""
    matmul_dtype = w1_ref.dtype

    # Packed broadcast params, read once: rows = [b1, b2, gamma, beta], shape (4, units) f32.
    params = params_ref[...]
    b1 = params[0:1, :]
    b2 = params[1:2, :]
    gamma = params[2:3, :]
    beta = params[3:4, :]

    # Linear 1 + ReLU (bf16 MXU operands, f32 accumulation, f32 epilogue).
    x = x_ref[...].astype(matmul_dtype)
    h = jnp.dot(x, w1_ref[...], preferred_element_type=jnp.float32)
    h = jnp.maximum(h + b1, 0.0)

    # Linear 2 + ReLU.
    h = jnp.dot(h.astype(matmul_dtype), w2_ref[...], preferred_element_type=jnp.float32)
    h = jnp.maximum(h + b2, 0.0)

    # LayerNorm over the (un-padded) feature dim, matching nn.LayerNorm:
    # biased variance, eps inside the rsqrt.  No lane masking needed because the
    # feature dim is exactly `units` (no padded lanes in h).
    mean = jnp.mean(h, axis=-1, keepdims=True)
    centered = h - mean
    var = jnp.mean(centered * centered, axis=-1, keepdims=True)
    normed = centered * lax.rsqrt(var + eps)
    o_ref[...] = (normed * gamma + beta).astype(o_ref.dtype)


def prepare_rnd_params(w1, b1, w2, b2, gamma, beta, *, matmul_dtype=jnp.bfloat16):
    """One-time parameter preparation (call at init, reuse across forward calls).

    w1: (in_size, units)  -- already transposed from torch's (units, in_size)
    w2: (units, units)
    b1/b2/gamma/beta: (units,)
    Returns (w1_cast, w2_cast, packed_params) where packed_params is (4, units) f32
    with rows [b1, b2, gamma, beta].
    """
    units = w1.shape[1]
    packed = jnp.stack([
        b1.reshape(units).astype(jnp.float32),
        b2.reshape(units).astype(jnp.float32),
        gamma.reshape(units).astype(jnp.float32),
        beta.reshape(units).astype(jnp.float32),
    ])
    return w1.astype(matmul_dtype), w2.astype(matmul_dtype), packed


def rnd_network_forward(x, prepared_params, *, block_b=512, eps=1e-5):
    """x: (B, in_size) float32; prepared_params from prepare_rnd_params.
    Returns (B, units) float32."""
    w1c, w2c, packed = prepared_params
    B, in_size = x.shape
    units = w1c.shape[1]
    f32 = jnp.float32

    # Batch tile: big tiles amortize per-grid-step overhead, but keep >= 2 grid steps
    # when the batch allows so both v7x TensorCores get work.
    tb = max(8, _round_up(min(block_b, B), 8))
    if tb >= B and B >= 16:
        tb = _round_up(pl.cdiv(B, 2), 8)
    bp = _round_up(B, tb)

    # Row-pad the batch only if needed (never lane-pads; no-op for the common case).
    xb = x if bp == B else jnp.zeros((bp, in_size), x.dtype).at[:B, :].set(x)

    # Resident operands: constant block index -> DMA'd once; single-buffered so they
    # occupy 1x (not 2x) their size in VMEM (v7x has only 64 MiB).
    def resident(shape):
        return pl.BlockSpec(shape, lambda i: (0, 0), pipeline_mode=pl.Buffered(1))

    # VMEM budget: double-buffered x/out tiles + single-buffered resident weights/params,
    # with headroom; clamp to [32 MiB, 48 MiB] so it stays safe on v7x's 64 MiB part
    # (raise toward 96 MiB on v5e/v6e only if tiles are made much larger).
    itemsize_w = jnp.dtype(w1c.dtype).itemsize
    needed = (2 * tb * in_size * 4 + 2 * tb * units * 4
              + (in_size * units + units * units) * itemsize_w + 4 * units * 4)
    vmem_limit = int(min(max(2 * needed, 32 * 1024 * 1024), 48 * 1024 * 1024))

    out = pl.pallas_call(
        functools.partial(_rnd_kernel, eps=eps),
        out_shape=jax.ShapeDtypeStruct((bp, units), f32),
        grid=(bp // tb,),
        in_specs=[
            pl.BlockSpec((tb, in_size), lambda i: (i, 0)),   # x: streamed per batch tile
            resident((in_size, units)),                       # w1 (resident)
            resident((units, units)),                         # w2 (resident)
            resident((4, units)),                             # [b1, b2, gamma, beta]
        ],
        out_specs=pl.BlockSpec((tb, units), lambda i: (i, 0)),
        compiler_params=pltpu.CompilerParams(
            dimension_semantics=("parallel",),   # batch tiles shard over v7x's 2 TCs
            vmem_limit_bytes=vmem_limit,
        ),
    )(xb, w1c, w2c, packed)

    return out if bp == B else out[:B]


def _reference(x, w1, b1, w2, b2, gamma, beta, *, matmul_dtype=jnp.float32, eps=1e-5):
    h = jnp.dot(x.astype(matmul_dtype), w1.astype(matmul_dtype),
                preferred_element_type=jnp.float32)
    h = jnp.maximum(h + b1.reshape(1, -1), 0.0)
    h = jnp.dot(h.astype(matmul_dtype), w2.astype(matmul_dtype),
                preferred_element_type=jnp.float32)
    h = jnp.maximum(h + b2.reshape(1, -1), 0.0)
    mean = jnp.mean(h, axis=-1, keepdims=True)
    var = jnp.mean((h - mean) ** 2, axis=-1, keepdims=True)
    return (h - mean) / jnp.sqrt(var + eps) * gamma.reshape(1, -1) + beta.reshape(1, -1)


if __name__ == "__main__":
    B, in_size, units = 256, 32, 32

    key = jax.random.PRNGKey(0)
    kx, k1, k2, k3, k4 = jax.random.split(key, 5)

    x = jax.random.normal(kx, (B, in_size), dtype=jnp.float32)

    # Deterministic param init (mimic PyTorch Linear default: U(-1/sqrt(fan_in), +...)).
    lim1 = 1.0 / jnp.sqrt(in_size)
    lim2 = 1.0 / jnp.sqrt(units)
    w1 = jax.random.uniform(k1, (in_size, units), jnp.float32, -lim1, lim1)
    b1 = jax.random.uniform(k2, (units,), jnp.float32, -lim1, lim1)
    w2 = jax.random.uniform(k3, (units, units), jnp.float32, -lim2, lim2)
    b2 = jax.random.uniform(k4, (units,), jnp.float32, -lim2, lim2)
    gamma = jnp.ones((units,), jnp.float32)   # nn.LayerNorm default weight
    beta = jnp.zeros((units,), jnp.float32)   # nn.LayerNorm default bias

    # One-time parameter preparation (kept across forward calls).
    prepared = jax.tree_util.tree_map(jax.block_until_ready,
                                      prepare_rnd_params(w1, b1, w2, b2, gamma, beta))

    out = jax.block_until_ready(rnd_network_forward(x, prepared))
    assert out.shape == (B, units)

    # Tight check vs a reference using the same bf16-operand / f32-accumulate matmuls.
    ref_bf16 = _reference(x, w1, b1, w2, b2, gamma, beta, matmul_dtype=jnp.bfloat16)
    assert jnp.allclose(out, ref_bf16, atol=1e-3, rtol=1e-3), "mismatch vs bf16-matmul reference"

    # Loose check vs the pure-f32 PyTorch-semantics reference (bf16 matmul rounding).
    ref_f32 = _reference(x, w1, b1, w2, b2, gamma, beta, matmul_dtype=jnp.float32)
    assert jnp.allclose(out, ref_f32, atol=5e-2, rtol=5e-2), "mismatch vs f32 reference"

    print("KERNEL_OK")
</pallas_src>

<mosaic_0001>
module attributes {stable_mosaic.version = 11 : i64} {
  func.func @_rnd_kernel(%arg0: i32, %arg1: memref<128x32xf32, #tpu.memory_space<vmem>>, %arg2: memref<32x32xbf16, #tpu.memory_space<vmem>>, %arg3: memref<32x32xbf16, #tpu.memory_space<vmem>>, %arg4: memref<4x32xf32, #tpu.memory_space<vmem>>, %arg5: memref<128x32xf32, #tpu.memory_space<vmem>>) attributes {dimension_semantics = [#tpu.dimension_semantics<parallel>], iteration_bounds = array<i64: 2>, scalar_prefetch = 0 : i64, scratch_operands = 0 : i64, tpu.core_type = #tpu.core_type<tc>, window_params = [{transform_indices = @transform_0, window_bounds = array<i64: 128, 32>}, {pipeline_mode = #tpu.pipeline_mode<synchronous>, transform_indices = @transform_1, window_bounds = array<i64: 32, 32>}, {pipeline_mode = #tpu.pipeline_mode<synchronous>, transform_indices = @transform_2, window_bounds = array<i64: 32, 32>}, {pipeline_mode = #tpu.pipeline_mode<synchronous>, transform_indices = @transform_3, window_bounds = array<i64: 4, 32>}, {transform_indices = @transform_4, window_bounds = array<i64: 128, 32>}]} {
    %c0 = arith.constant 0 : index
    %c0_0 = arith.constant 0 : index
    %0 = vector.load %arg4[%c0, %c0_0] : memref<4x32xf32, #tpu.memory_space<vmem>>, vector<4x32xf32>
    %1 = vector.extract_strided_slice %0 {offsets = [0, 0], sizes = [1, 32], strides = [1, 1]} : vector<4x32xf32> to vector<1x32xf32>
    %2 = vector.extract_strided_slice %0 {offsets = [1, 0], sizes = [1, 32], strides = [1, 1]} : vector<4x32xf32> to vector<1x32xf32>
    %3 = vector.extract_strided_slice %0 {offsets = [2, 0], sizes = [1, 32], strides = [1, 1]} : vector<4x32xf32> to vector<1x32xf32>
    %4 = vector.extract_strided_slice %0 {offsets = [3, 0], sizes = [1, 32], strides = [1, 1]} : vector<4x32xf32> to vector<1x32xf32>
    %c0_1 = arith.constant 0 : index
    %c0_2 = arith.constant 0 : index
    %5 = vector.load %arg1[%c0_1, %c0_2] : memref<128x32xf32, #tpu.memory_space<vmem>>, vector<128x32xf32>
    %6 = arith.truncf %5 : vector<128x32xf32> to vector<128x32xbf16>
    %c0_3 = arith.constant 0 : index
    %c0_4 = arith.constant 0 : index
    %7 = vector.load %arg2[%c0_3, %c0_4] : memref<32x32xbf16, #tpu.memory_space<vmem>>, vector<32x32xbf16>
    %cst = arith.constant dense<0.000000e+00> : vector<128x32xf32>
    %8 = tpu.matmul %6, %7, %cst {dimension_numbers = #tpu.dot_dimension_numbers<[1], [0], [0], [1], [0, 0, 1, 1], [], []>} : vector<128x32xbf16>, vector<32x32xbf16>, vector<128x32xf32> -> vector<128x32xf32>
    %9 = vector.broadcast %1 : vector<1x32xf32> to vector<128x32xf32>
    %10 = arith.addf %8, %9 : vector<128x32xf32>
    %cst_5 = arith.constant 0.000000e+00 : f32
    %11 = vector.broadcast %cst_5 : f32 to vector<128x32xf32>
    %12 = arith.maximumf %10, %11 : vector<128x32xf32>
    %13 = arith.truncf %12 : vector<128x32xf32> to vector<128x32xbf16>
    %c0_6 = arith.constant 0 : index
    %c0_7 = arith.constant 0 : index
    %14 = vector.load %arg3[%c0_6, %c0_7] : memref<32x32xbf16, #tpu.memory_space<vmem>>, vector<32x32xbf16>
    %cst_8 = arith.constant dense<0.000000e+00> : vector<128x32xf32>
    %15 = tpu.matmul %13, %14, %cst_8 {dimension_numbers = #tpu.dot_dimension_numbers<[1], [0], [0], [1], [0, 0, 1, 1], [], []>} : vector<128x32xbf16>, vector<32x32xbf16>, vector<128x32xf32> -> vector<128x32xf32>
    %16 = vector.broadcast %2 : vector<1x32xf32> to vector<128x32xf32>
    %17 = arith.addf %15, %16 : vector<128x32xf32>
    %cst_9 = arith.constant 0.000000e+00 : f32
    %18 = vector.broadcast %cst_9 : f32 to vector<128x32xf32>
    %19 = arith.maximumf %17, %18 : vector<128x32xf32>
    %cst_10 = arith.constant dense<0.000000e+00> : vector<128xf32>
    %20 = vector.multi_reduction <add>, %19, %cst_10 [1] : vector<128x32xf32> to vector<128xf32>
    %21 = vector.shape_cast %20 : vector<128xf32> to vector<128x1xf32>
    %cst_11 = arith.constant 3.200000e+01 : f32
    %22 = vector.broadcast %cst_11 : f32 to vector<128x1xf32>
    %23 = arith.divf %21, %22 : vector<128x1xf32>
    %24 = vector.broadcast %23 : vector<128x1xf32> to vector<128x32xf32>
    %25 = arith.subf %19, %24 : vector<128x32xf32>
    %26 = arith.mulf %25, %25 : vector<128x32xf32>
    %cst_12 = arith.constant dense<0.000000e+00> : vector<128xf32>
    %27 = vector.multi_reduction <add>, %26, %cst_12 [1] : vector<128x32xf32> to vector<128xf32>
    %28 = vector.shape_cast %27 : vector<128xf32> to vector<128x1xf32>
    %cst_13 = arith.constant 3.200000e+01 : f32
    %29 = vector.broadcast %cst_13 : f32 to vector<128x1xf32>
    %30 = arith.divf %28, %29 : vector<128x1xf32>
    %cst_14 = arith.constant 9.99999974E-6 : f32
    %31 = vector.broadcast %cst_14 : f32 to vector<128x1xf32>
    %32 = arith.addf %30, %31 : vector<128x1xf32>
    %33 = math.rsqrt %32 : vector<128x1xf32>
    %34 = vector.broadcast %33 : vector<128x1xf32> to vector<128x32xf32>
    %35 = arith.mulf %25, %34 : vector<128x32xf32>
    %36 = vector.broadcast %3 : vector<1x32xf32> to vector<128x32xf32>
    %37 = arith.mulf %35, %36 : vector<128x32xf32>
    %38 = vector.broadcast %4 : vector<1x32xf32> to vector<128x32xf32>
    %39 = arith.addf %37, %38 : vector<128x32xf32>
    %c0_15 = arith.constant 0 : index
    %c0_16 = arith.constant 0 : index
    %40 = vector.load %arg5[%c0_15, %c0_16] : memref<128x32xf32, #tpu.memory_space<vmem>>, vector<128x32xf32>
    tpu.vector_store %arg5[%c0_15, %c0_16], %39 {strides = array<i32>} : memref<128x32xf32, #tpu.memory_space<vmem>>, vector<128x32xf32>,
    return
  }
  func.func @transform_0(%arg0: i32) -> (i32, i32) {
    %c0_i32 = arith.constant 0 : i32
    %c0_i32_0 = arith.constant 0 : i32
    return %arg0, %c0_i32 : i32, i32
  }
  func.func @transform_1(%arg0: i32) -> (i32, i32) {
    %c0_i32 = arith.constant 0 : i32
    %c0_i32_0 = arith.constant 0 : i32
    %c0_i32_1 = arith.constant 0 : i32
    return %c0_i32, %c0_i32_0 : i32, i32
  }
  func.func @transform_2(%arg0: i32) -> (i32, i32) {
    %c0_i32 = arith.constant 0 : i32
    %c0_i32_0 = arith.constant 0 : i32
    %c0_i32_1 = arith.constant 0 : i32
    return %c0_i32, %c0_i32_0 : i32, i32
  }
  func.func @transform_3(%arg0: i32) -> (i32, i32) {
    %c0_i32 = arith.constant 0 : i32
    %c0_i32_0 = arith.constant 0 : i32
    %c0_i32_1 = arith.constant 0 : i32
    return %c0_i32, %c0_i32_0 : i32, i32
  }
  func.func @transform_4(%arg0: i32) -> (i32, i32) {
    %c0_i32 = arith.constant 0 : i32
    %c0_i32_0 = arith.constant 0 : i32
    return %arg0, %c0_i32 : i32, i32
  }
}

</mosaic_0001>

<bundles_post_ra>
// kernel: tpu_custom_call.1
= control target key start
LH: loop header
LB: loop body
LE: loop exit
PB: predicated region body
PF: predicated region fallthrough
CT: control target
= control target key end

     0   :  { %s1039_s15 = smov 0   ;;  %s1436_s0 = inlined_call_operand.vmem [shape: f32[256,32], index: 0, kind: input, shape index: {}]   ;;  %s1437_s1 = inlined_call_operand.vmem [shape: bf16[32,32], index: 1, kind: input, shape index: {}]   ;;  %s1438_s2 = inlined_call_operand.vmem [shape: bf16[32,32], index: 2, kind: input, shape index: {}]   ;;  %s1439_s3 = inlined_call_operand.vmem [shape: f32[4,32], index: 3, kind: input, shape index: {}]   ;;  %s1440_s4 = inlined_call_operand.vmem [shape: f32[256,32], index: 4, kind: output, shape index: {}]  }
   0x1 LB: > { %s871_s16 = sadd.s32 4294967295, %s1012_s15   ;;  %p875_p0 = scmp.ge.s32.totalorder %s1012_s15, 1  ;;  %s1012_s15 = sphi %s1039_s15, %s14_s15  }
   0x2   : > { %p163_p1 = scmp.lt.s32.totalorder %s1012_s15, 3 }
   0x4   : > { %p164_p2 = pnand %p875_p0, %p163_p1 }
   0x5   : > { %s876_s19 = sshll.u32 (!%p164_p2), %s871_s16, 4 }
   0x6   : > { %167 = sbr.rel (%p164_p2) target bundleno = 767 (0x2ff), region = 36  ;;  %p190_p3 = scmp.lt.s32.totalorder (!%p164_p2), %s876_s19, 31 }
   0xb   : > { %v970_v0 = vld [vmem:[%s1437_s1 + $0x8] sm:$0xff]   ;;  %v971_v1 = vld [vmem:[%s1437_s1] sm:$0xff]   ;;  %s1442_s19 = smov (!%p190_p3, %s876_s19), 31  ;;  %vm247_vm0 = vcmask 261120   ;;  %v231_v28 = vlaneseq }
   0xc   : > { %922 = vmatprep.subr.bf16.mxu0 %v970_v0  ;;  %s877_s22 = sshll.u32 %s1442_s19, 3  ;;  %v972_v26 = vld [vmem:[%s1438_s2 + $0x8] sm:$0xff]   ;;  %v973_v27 = vld [vmem:[%s1438_s2] sm:$0xff]  }
   0xd   : > { %923 = vmatpush3.bf16.msra.mxu0 %v970_v0  ;;  %s1061_s25 = scalar_lea.vmem %s1436_s0, %s877_s22  ;;  %942 = vmatprep.subr.bf16.mxu1 %v972_v26  ;;  %v1093_v29 = vshrl.u32 %v231_v28, 7  ;;  %v1099_v31 = vld [vmem:[%s1439_s3] sm:$0xf]  ;;  %s1353_s8 = scalar_lea.vmem %s1440_s4, %s877_s22 }
   0xe   : > { %924 = vmatprep.subr.bf16.mxu0 %v971_v1  ;;  %v203_v2 = vld [vmem:[%s1061_s25] sm:$0xff]  ;;  %v204_v3 = vld [vmem:[%s1061_s25 + $0x8] sm:$0xff]  ;;  %v205_v4 = vld [vmem:[%s1061_s25 + $0x10] sm:$0xff]  ;;  %943 = vmatpush3.bf16.msra.mxu1 %v972_v26 }
   0xf   : > { %v219_v5 = vpack.c.bf16 %v204_v3, %v203_v2  ;;  %v206_v6 = vld [vmem:[%s1061_s25 + $0x18] sm:$0xff]  ;;  %v207_v7 = vld [vmem:[%s1061_s25 + $0x20] sm:$0xff]  ;;  %v208_v8 = vld [vmem:[%s1061_s25 + $0x28] sm:$0xff]  ;;  %944 = vmatprep.subr.bf16.mxu1 %v973_v27  ;;  %v233_v30 = vsub.s32 0, %v1093_v29 }
  0x10   : > { %v220_v9 = vpack.c.bf16 %v206_v6, %v205_v4  ;;  %v221_v10 = vpack.c.bf16 %v208_v8, %v207_v7  ;;  %v209_v11 = vld [vmem:[%s1061_s25 + $0x30] sm:$0xff]  ;;  %v210_v12 = vld [vmem:[%s1061_s25 + $0x38] sm:$0xff]  ;;  %v211_v13 = vld [vmem:[%s1061_s25 + $0x40] sm:$0xff] }
  0x11   : > { %925 = vmatpush3.bf16.msra.mxu0 %v971_v1  ;;  %926 = vmatprep.mubr.msk.bf16.mxu0 %vm247_vm0, %v219_v5  ;;  %v212_v14 = vld [vmem:[%s1061_s25 + $0x48] sm:$0xff]  ;;  %v222_v15 = vpack.c.bf16 %v210_v12, %v209_v11  ;;  %v213_v17 = vld [vmem:[%s1061_s25 + $0x50] sm:$0xff]  ;;  %v214_v18 = vld [vmem:[%s1061_s25 + $0x58] sm:$0xff]  ;;  %v234_v33 = vrot.slane %v1099_v31, %v233_v30 }
  0x12   : > { %v223_v16 = vpack.c.bf16 %v212_v14, %v211_v13  ;;  %v215_v19 = vld [vmem:[%s1061_s25 + $0x60] sm:$0xff]  ;;  %v216_v20 = vld [vmem:[%s1061_s25 + $0x68] sm:$0xff]  ;;  %v224_v21 = vpack.c.bf16 %v214_v18, %v213_v17  ;;  %v217_v23 = vld [vmem:[%s1061_s25 + $0x70] sm:$0xff]  ;;  %945 = vmatpush3.bf16.msra.mxu1 %v973_v27 }
  0x13   : > { %v225_v22 = vpack.c.bf16 %v216_v20, %v215_v19  ;;  %v218_v24 = vld [vmem:[%s1061_s25 + $0x78] sm:$0xff] }
  0x14   : > { %927 = vmatmul.mubr.msk.bf16.vlgmr.msra.gmra.mxu0 %vm247_vm0, %v220_v9  ;;  %v226_v25 = vpack.c.bf16 %v218_v24, %v217_v23 }
  0x15   : > { %930 = vmatprep.mubr.msk.bf16.mxu0 %vm247_vm0, %v221_v10 }
  0x1c   : > { %931 = vmatmul.mubr.msk.bf16.gmra.mxu0 %vm247_vm0, %v222_v15 }
  0x1d   : > { %934 = vmatprep.mubr.msk.bf16.mxu0 %vm247_vm0, %v223_v16 }
  0x24   : > { %935 = vmatmul.mubr.msk.bf16.gmra.mxu0 %vm247_vm0, %v224_v21 }
  0x25   : > { %938 = vmatprep.mubr.msk.bf16.mxu0 %vm247_vm0, %v225_v22 }
  0x2c   : > { %939 = vmatmul.mubr.msk.bf16.gmra.mxu0 %vm247_vm0, %v226_v25  ;;  %v399_v25 = vsub.s32 1, %v1093_v29 }
  0x2e   : > { %v1112_v26 = vrot.slane %v1099_v31, %v399_v25 }
  0xd4   : > { %v928_v32 = vpop.f32.mrf.mxu0 }
  0xd5   : > { %v315_v38 = vadd.f32 %v928_v32, %v234_v33 }
  0xd6   : > { %v306_v34 = vpop.f32.mrf.mxu0 }
  0xd7   : > { %v307_v36 = vadd.f32 %v306_v34, %v234_v33  ;;  %v371_v45 = vmax.f32 %v315_v38, 0.0 }
  0xd8   : > { %v929_v35 = vpop.f32.mrf.mxu0 }
  0xd9   : > { %v318_v37 = vadd.f32 %v929_v35, %v234_v33  ;;  %v369_v43 = vmax.f32 %v307_v36, 0.0 }
  0xda   : > { %v309_v39 = vpop.f32.mrf.mxu0 }
  0xdb   : > { %v310_v40 = vadd.f32 %v309_v39, %v234_v33  ;;  %v372_v41 = vmax.f32 %v318_v37, 0.0 }
  0xdc   : > { %v932_v42 = vpop.f32.mrf.mxu0 }
  0xdd   : > { %v370_v44 = vmax.f32 %v310_v40, 0.0  ;;  %v386_v48 = vpack.c.bf16 %v372_v41, %v371_v45  ;;  %v331_v52 = vadd.f32 %v932_v42, %v234_v33 }
  0xde   : > { %v322_v46 = vpop.f32.mrf.mxu0 }
  0xdf   : > { %v385_v47 = vpack.c.bf16 %v370_v44, %v369_v43  ;;  %v323_v50 = vadd.f32 %v322_v46, %v234_v33  ;;  %v375_v59 = vmax.f32 %v331_v52, 0.0 }
  0xe0   : > { %v933_v49 = vpop.f32.mrf.mxu0 }
  0xe1   : > { %v334_v51 = vadd.f32 %v933_v49, %v234_v33  ;;  %946 = vmatprep.mubr.msk.bf16.mxu1 %vm247_vm0, %v385_v47  ;;  %v373_v57 = vmax.f32 %v323_v50, 0.0 }
  0xe2   : > { %v325_v53 = vpop.f32.mrf.mxu0  ;;  %947 = vmatmul.mubr.msk.bf16.vlgmr.msra.gmra.mxu1 %vm247_vm0, %v386_v48 }
  0xe3   : > { %v326_v54 = vadd.f32 %v325_v53, %v234_v33  ;;  %v376_v55 = vmax.f32 %v334_v51, 0.0 }
  0xe4   : > { %v936_v56 = vpop.f32.mrf.mxu0 }
  0xe5   : > { %v374_v58 = vmax.f32 %v326_v54, 0.0  ;;  %v388_v62 = vpack.c.bf16 %v376_v55, %v375_v59  ;;  %v347_v2 = vadd.f32 %v936_v56, %v234_v33 }
  0xe6   : > { %v338_v60 = vpop.f32.mrf.mxu0 }
  0xe7   : > { %v387_v61 = vpack.c.bf16 %v374_v58, %v373_v57  ;;  %v339_v0 = vadd.f32 %v338_v60, %v234_v33  ;;  %v379_v9 = vmax.f32 %v347_v2, 0.0 }
  0xe8   : > { %v937_v63 = vpop.f32.mrf.mxu0 }
  0xe9   : > { %v350_v1 = vadd.f32 %v937_v63, %v234_v33  ;;  %950 = vmatprep.mubr.msk.bf16.mxu1 %vm247_vm0, %v387_v61  ;;  %v377_v7 = vmax.f32 %v339_v0, 0.0 }
  0xea   : > { %v341_v3 = vpop.f32.mrf.mxu0  ;;  %951 = vmatmul.mubr.msk.bf16.gmra.mxu1 %vm247_vm0, %v388_v62 }
  0xeb   : > { %v342_v4 = vadd.f32 %v341_v3, %v234_v33  ;;  %v380_v5 = vmax.f32 %v350_v1, 0.0 }
  0xec   : > { %v940_v6 = vpop.f32.mrf.mxu0 }
  0xed   : > { %v378_v8 = vmax.f32 %v342_v4, 0.0  ;;  %v390_v12 = vpack.c.bf16 %v380_v5, %v379_v9  ;;  %v363_v16 = vadd.f32 %v940_v6, %v234_v33 }
  0xee   : > { %v354_v10 = vpop.f32.mrf.mxu0 }
  0xef   : > { %v389_v11 = vpack.c.bf16 %v378_v8, %v377_v7  ;;  %v355_v14 = vadd.f32 %v354_v10, %v234_v33  ;;  %v383_v22 = vmax.f32 %v363_v16, 0.0 }
  0xf0   : > { %v941_v13 = vpop.f32.mrf.mxu0 }
  0xf1   : > { %v366_v15 = vadd.f32 %v941_v13, %v234_v33  ;;  %954 = vmatprep.mubr.msk.bf16.mxu1 %vm247_vm0, %v389_v11  ;;  %v381_v20 = vmax.f32 %v355_v14, 0.0 }
  0xf2   : > { %v357_v17 = vpop.f32.mrf.mxu0  ;;  %955 = vmatmul.mubr.msk.bf16.gmra.mxu1 %vm247_vm0, %v390_v12 }
  0xf3   : > { %v358_v18 = vadd.f32 %v357_v17, %v234_v33  ;;  %v384_v19 = vmax.f32 %v366_v15, 0.0 }
  0xf5   : > { %v382_v21 = vmax.f32 %v358_v18, 0.0  ;;  %v392_v24 = vpack.c.bf16 %v384_v19, %v383_v22 }
  0xf7   : > { %v391_v23 = vpack.c.bf16 %v382_v21, %v381_v20 }
  0xf9   : > { %958 = vmatprep.mubr.msk.bf16.mxu1 %vm247_vm0, %v391_v23 }
  0xfa   : > { %959 = vmatmul.mubr.msk.bf16.gmra.mxu1 %vm247_vm0, %v392_v24 }
 0x1a2   : > { %v948_v27 = vpop.f32.mrf.mxu1 }
 0x1a3   : > { %v1115_v28 = vadd.f32 %v948_v27, %v1112_v26 }
 0x1a4   : > { %v471_v30 = vpop.f32.mrf.mxu1 }
 0x1a5   : > { %v536_v32 = vmax.f32 %v1115_v28, 0.0  ;;  %v1119_v33 = vadd.f32 %v471_v30, %v1112_v26 }
 0x1a6   : > { %v949_v34 = vpop.f32.mrf.mxu1 }
 0x1a7   : > { %v534_v35 = vmax.f32 %v1119_v33, 0.0  ;;  %v1123_v36 = vadd.f32 %v949_v34, %v1112_v26  ;;  %v556_v37 = vsel %vm247_vm0, %v536_v32, 0.0 }
 0x1a8   : > { %557 = vadd.xlane.f32.xlu1 %v556_v37  ;;  %v474_v38 = vpop.f32.mrf.mxu1 }
 0x1a9   : > { %v537_v39 = vmax.f32 %v1123_v36, 0.0  ;;  %v1130_v40 = vadd.f32 %v474_v38, %v1112_v26  ;;  %v550_v41 = vsel %vm247_vm0, %v534_v35, 0.0 }
 0x1aa   : > { %v952_v42 = vpop.f32.mrf.mxu1  ;;  %551 = vadd.xlane.f32.xlu0 %v550_v41 }
 0x1ab   : > { %v535_v43 = vmax.f32 %v1130_v40, 0.0  ;;  %v1137_v44 = vadd.f32 %v952_v42, %v1112_v26  ;;  %v559_v45 = vsel %vm247_vm0, %v537_v39, 0.0 }
 0x1ac   : > { %560 = vadd.xlane.f32.xlu1 %v559_v45  ;;  %v487_v46 = vpop.f32.mrf.mxu1 }
 0x1ad   : > { %v540_v47 = vmax.f32 %v1137_v44, 0.0  ;;  %v1144_v48 = vadd.f32 %v487_v46, %v1112_v26  ;;  %v553_v49 = vsel %vm247_vm0, %v535_v43, 0.0 }
 0x1ae   : > { %v953_v50 = vpop.f32.mrf.mxu1  ;;  %554 = vadd.xlane.f32.xlu0 %v553_v49 }
 0x1af   : > { %v1150_v51 = vadd.f32 %v953_v50, %v1112_v26  ;;  %v538_v53 = vmax.f32 %v1144_v48, 0.0  ;;  %v568_v56 = vsel %vm247_vm0, %v540_v47, 0.0 }
 0x1b0   : > { %v490_v52 = vpop.f32.mrf.mxu1 }
 0x1b1   : > { %v541_v54 = vmax.f32 %v1150_v51, 0.0  ;;  %v1155_v55 = vadd.f32 %v490_v52, %v1112_v26  ;;  %v562_v0 = vsel %vm247_vm0, %v538_v53, 0.0 }
 0x1b2   : > { %v956_v57 = vpop.f32.mrf.mxu1  ;;  %569 = vadd.xlane.f32.xlu0 %v568_v56 }
 0x1b3   : > { %v539_v58 = vmax.f32 %v1155_v55, 0.0  ;;  %v1162_v59 = vadd.f32 %v956_v57, %v1112_v26  ;;  %v571_v60 = vsel %vm247_vm0, %v541_v54, 0.0 }
 0x1b4   : > { %572 = vadd.xlane.f32.xlu1 %v571_v60  ;;  %v503_v61 = vpop.f32.mrf.mxu1 }
 0x1b5   : > { %v544_v62 = vmax.f32 %v1162_v59, 0.0  ;;  %v1169_v63 = vadd.f32 %v503_v61, %v1112_v26  ;;  %v565_v3 = vsel %vm247_vm0, %v539_v58, 0.0 }
 0x1b6   : > { %v957_v1 = vpop.f32.mrf.mxu1  ;;  %563 = vadd.xlane.f32.xlu0 %v562_v0 }
 0x1b7   : > { %v1175_v2 = vadd.f32 %v957_v1, %v1112_v26  ;;  %v542_v5 = vmax.f32 %v1169_v63, 0.0  ;;  %v580_v8 = vsel %vm247_vm0, %v544_v62, 0.0 }
 0x1b8   : > { %v506_v4 = vpop.f32.mrf.mxu1  ;;  %566 = vadd.xlane.f32.xlu1 %v565_v3 }
 0x1b9   : > { %v545_v6 = vmax.f32 %v1175_v2, 0.0  ;;  %v1183_v7 = vadd.f32 %v506_v4, %v1112_v26  ;;  %v574_v15 = vsel %vm247_vm0, %v542_v5, 0.0 }
 0x1ba   : > { %v960_v9 = vpop.f32.mrf.mxu1  ;;  %581 = vadd.xlane.f32.xlu0 %v580_v8 }
 0x1bb   : > { %v543_v10 = vmax.f32 %v1183_v7, 0.0  ;;  %v583_v11 = vsel %vm247_vm0, %v545_v6, 0.0  ;;  %v1193_v13 = vadd.f32 %v960_v9, %v1112_v26 }
 0x1bc   : > { %v519_v12 = vpop.f32.mrf.mxu1  ;;  %584 = vadd.xlane.f32.xlu1 %v583_v11 }
 0x1bd   : > { %v1196_v14 = vadd.f32 %v519_v12, %v1112_v26  ;;  %v577_v18 = vsel %vm247_vm0, %v543_v10, 0.0  ;;  %v548_v20 = vmax.f32 %v1193_v13, 0.0 }
 0x1be   : > { %v961_v16 = vpop.f32.mrf.mxu1  ;;  %575 = vadd.xlane.f32.xlu0 %v574_v15 }
 0x1bf   : > { %v546_v17 = vmax.f32 %v1196_v14, 0.0  ;;  %v1207_v21 = vadd.f32 %v961_v16, %v1112_v26  ;;  %v592_v30 = vsel %vm247_vm0, %v548_v20, 0.0 }
 0x1c0   : > { %v522_v19 = vpop.f32.mrf.mxu1  ;;  %578 = vadd.xlane.f32.xlu1 %v577_v18 }
 0x1c1   : > { %v1210_v22 = vadd.f32 %v522_v19, %v1112_v26  ;;  %v586_v23 = vsel %vm247_vm0, %v546_v17, 0.0  ;;  %v549_v25 = vmax.f32 %v1207_v21, 0.0 }
 0x1c2   : > { %587 = vadd.xlane.f32.xlu0 %v586_v23 }
 0x1c3   : > { %v547_v24 = vmax.f32 %v1210_v22, 0.0  ;;  %v595_v26 = vsel %vm247_vm0, %v549_v25, 0.0 }
 0x1c5   : > { %v589_v27 = vsel %vm247_vm0, %v547_v24, 0.0 }
 0x1c6   : > { %590 = vadd.xlane.f32.xlu1 %v589_v27  ;;  %593 = vadd.xlane.f32.xlu0 %v592_v30 }
 0x1ca   : > { %596 = vadd.xlane.f32.xlu1 %v595_v26 }
 0x231   : > { %v558_v34 = vpop.xlane.xlu1 %557 }
 0x232   : > { %v601_v37 = vmul.f32 0.03125, %v558_v34 }
 0x233   : > { %v552_v38 = vpop.xlane.xlu0 %551 }
 0x234   : > { %v1228_v41 = vsub.f32 %v536_v32, %v601_v37  ;;  %v599_v42 = vmul.f32 0.03125, %v552_v38 }
 0x235   : > { %v561_v45 = vpop.xlane.xlu1 %560 }
 0x236   : > { %v1232_v46 = vsub.f32 %v534_v35, %v599_v42  ;;  %v602_v49 = vmul.f32 0.03125, %v561_v45  ;;  %v633_v50 = vmul.f32 %v1228_v41, %v1228_v41 }
 0x237   : > { %v555_v52 = vpop.xlane.xlu0 %554 }
 0x238   : > { %v1238_v56 = vsub.f32 %v537_v39, %v602_v49  ;;  %v600_v57 = vmul.f32 0.03125, %v555_v52  ;;  %v653_v28 = vsel %vm247_vm0, %v633_v50, 0.0  ;;  %v631_v32 = vmul.f32 %v1232_v46, %v1232_v46 }
 0x239   : > { %654 = vadd.xlane.f32.xlu0 %v653_v28 }
 0x23a   : > { %v1245_v33 = vsub.f32 %v535_v43, %v600_v57  ;;  %v634_v35 = vmul.f32 %v1238_v56, %v1238_v56  ;;  %v647_v39 = vsel %vm247_vm0, %v631_v32, 0.0 }
 0x23b   : > { %v570_v60 = vpop.xlane.xlu0 %569 }
 0x23c   : > { %v605_v61 = vmul.f32 0.03125, %v570_v60  ;;  %v656_v36 = vsel %vm247_vm0, %v634_v35, 0.0  ;;  %v632_v0 = vmul.f32 %v1245_v33, %v1245_v33 }
 0x23d   : > { %v573_v1 = vpop.xlane.xlu1 %572  ;;  %657 = vadd.xlane.f32.xlu1 %v656_v36  ;;  %648 = vadd.xlane.f32.xlu0 %v647_v39 }
 0x23e   : > { %v1255_v40 = vsub.f32 %v540_v47, %v605_v61  ;;  %v606_v43 = vmul.f32 0.03125, %v573_v1  ;;  %v650_v9 = vsel %vm247_vm0, %v632_v0, 0.0 }
 0x23f   : > { %v564_v3 = vpop.xlane.xlu0 %563 }
 0x240   : > { %v1259_v4 = vsub.f32 %v541_v54, %v606_v43  ;;  %v603_v8 = vmul.f32 0.03125, %v564_v3  ;;  %v637_v11 = vmul.f32 %v1255_v40, %v1255_v40 }
 0x241   : > { %v567_v12 = vpop.xlane.xlu1 %566  ;;  %651 = vadd.xlane.f32.xlu1 %v650_v9 }
 0x242   : > { %v1266_v15 = vsub.f32 %v538_v53, %v603_v8  ;;  %v604_v44 = vmul.f32 0.03125, %v567_v12  ;;  %v665_v47 = vsel %vm247_vm0, %v637_v11, 0.0  ;;  %v638_v51 = vmul.f32 %v1259_v4, %v1259_v4 }
 0x243   : > { %666 = vadd.xlane.f32.xlu0 %v665_v47  ;;  %v582_v54 = vpop.xlane.xlu0 %581 }
 0x244   : > { %v1273_v16 = vsub.f32 %v539_v58, %v604_v44  ;;  %v609_v18 = vmul.f32 0.03125, %v582_v54  ;;  %v668_v19 = vsel %vm247_vm0, %v638_v51, 0.0  ;;  %v635_v48 = vmul.f32 %v1266_v15, %v1266_v15 }
 0x245   : > { %v585_v53 = vpop.xlane.xlu1 %584  ;;  %669 = vadd.xlane.f32.xlu1 %v668_v19 }
 0x246   : > { %v1280_v23 = vsub.f32 %v544_v62, %v609_v18  ;;  %v610_v27 = vmul.f32 0.03125, %v585_v53  ;;  %v659_v30 = vsel %vm247_vm0, %v635_v48, 0.0  ;;  %v636_v55 = vmul.f32 %v1273_v16, %v1273_v16 }
 0x247   : > { %660 = vadd.xlane.f32.xlu0 %v659_v30  ;;  %v576_v58 = vpop.xlane.xlu0 %575  ;;  %v761_v30 = vsub.s32 2, %v1093_v29 }
 0x248   : > { %v1287_v26 = vsub.f32 %v545_v6, %v610_v27  ;;  %v607_v34 = vmul.f32 0.03125, %v576_v58  ;;  %v662_v37 = vsel %vm247_vm0, %v636_v55, 0.0  ;;  %v641_v59 = vmul.f32 %v1280_v23, %v1280_v23 }
 0x249   : > { %v579_v62 = vpop.xlane.xlu1 %578  ;;  %663 = vadd.xlane.f32.xlu1 %v662_v37 }
 0x24a   : > { %v1294_v38 = vsub.f32 %v542_v5, %v607_v34  ;;  %v608_v42 = vmul.f32 0.03125, %v579_v62  ;;  %v677_v45 = vsel %vm247_vm0, %v641_v59, 0.0  ;;  %v642_v2 = vmul.f32 %v1287_v26, %v1287_v26 }
 0x24b   : > { %678 = vadd.xlane.f32.xlu0 %v677_v45  ;;  %v588_v6 = vpop.xlane.xlu0 %587  ;;  %v781_v34 = vsub.s32 3, %v1093_v29  ;;  %v1341_v45 = vrot.slane %v1099_v31, %v761_v30 }
 0x24c   : > { %v1301_v49 = vsub.f32 %v543_v10, %v608_v42  ;;  %v611_v50 = vmul.f32 0.03125, %v588_v6  ;;  %v680_v52 = vsel %vm247_vm0, %v642_v2, 0.0  ;;  %v639_v63 = vmul.f32 %v1294_v38, %v1294_v38 }
 0x24d   : > { %681 = vadd.xlane.f32.xlu1 %v680_v52  ;;  %v1344_v52 = vrot.slane %v1099_v31, %v781_v34 }
 0x24e   : > { %v1308_v5 = vsub.f32 %v546_v17, %v611_v50  ;;  %v671_v57 = vsel %vm247_vm0, %v639_v63, 0.0  ;;  %v640_v28 = vmul.f32 %v1301_v49, %v1301_v49 }
 0x24f   : > { %v591_v32 = vpop.xlane.xlu1 %590  ;;  %672 = vadd.xlane.f32.xlu0 %v671_v57  ;;  %v594_v7 = vpop.xlane.xlu0 %593 }
 0x250   : > { %v612_v10 = vmul.f32 0.03125, %v591_v32  ;;  %v613_v35 = vmul.f32 0.03125, %v594_v7  ;;  %v674_v60 = vsel %vm247_vm0, %v640_v28, 0.0  ;;  %v643_v61 = vmul.f32 %v1308_v5, %v1308_v5 }
 0x251   : > { %675 = vadd.xlane.f32.xlu1 %v674_v60 }
 0x252   : > { %v1318_v14 = vsub.f32 %v547_v24, %v612_v10  ;;  %v1322_v17 = vsub.f32 %v548_v20, %v613_v35  ;;  %v683_v36 = vsel %vm247_vm0, %v643_v61, 0.0 }
 0x253   : > { %v597_v39 = vpop.xlane.xlu1 %596  ;;  %684 = vadd.xlane.f32.xlu0 %v683_v36 }
 0x254   : > { %v614_v0 = vmul.f32 0.03125, %v597_v39  ;;  %v644_v1 = vmul.f32 %v1318_v14, %v1318_v14  ;;  %v645_v43 = vmul.f32 %v1322_v17, %v1322_v17 }
 0x256   : > { %v1331_v22 = vsub.f32 %v549_v25, %v614_v0  ;;  %v686_v24 = vsel %vm247_vm0, %v644_v1, 0.0  ;;  %v689_v13 = vsel %vm247_vm0, %v645_v43, 0.0 }
 0x257   : > { %687 = vadd.xlane.f32.xlu1 %v686_v24  ;;  %690 = vadd.xlane.f32.xlu0 %v689_v13 }
 0x258   : > { %v646_v20 = vmul.f32 %v1331_v22, %v1331_v22 }
 0x25a   : > { %v692_v3 = vsel %vm247_vm0, %v646_v20, 0.0 }
 0x25b   : > { %693 = vadd.xlane.f32.xlu1 %v692_v3 }
 0x2c2   : > { %v655_v8 = vpop.xlane.xlu0 %654 }
 0x2c3   : > { %v697_v9 = vmul.f32 0.03125, %v655_v8 }
 0x2c5   : > { %v713_v11 = vadd.f32 1e-05, %v697_v9 }
 0x2c6   : > { %v658_v12 = vpop.xlane.xlu1 %657  ;;  %v649_v44 = vpop.xlane.xlu0 %648 }
 0x2c7   : > { %974 = vrsqrt.f32 %v713_v11  ;;  %v698_v21 = vmul.f32 0.03125, %v658_v12  ;;  %v695_v25 = vmul.f32 0.03125, %v649_v44 }
 0x2c9   : > { %v714_v47 = vadd.f32 1e-05, %v698_v21  ;;  %v711_v51 = vadd.f32 1e-05, %v695_v25 }
 0x2ca   : > { %v652_v54 = vpop.xlane.xlu1 %651 }
 0x2cb   : > { %976 = vrsqrt.f32 %v714_v47  ;;  %v696_v18 = vmul.f32 0.03125, %v652_v54 }
 0x2cc   : > { %978 = vrsqrt.f32 %v711_v51  ;;  %v667_v19 = vpop.xlane.xlu0 %666 }
 0x2cd   : > { %v712_v48 = vadd.f32 1e-05, %v696_v18  ;;  %v701_v53 = vmul.f32 0.03125, %v667_v19 }
 0x2ce   : > { %v670_v27 = vpop.xlane.xlu1 %669 }
 0x2cf   : > { %980 = vrsqrt.f32 %v712_v48  ;;  %v717_v55 = vadd.f32 1e-05, %v701_v53  ;;  %v702_v58 = vmul.f32 0.03125, %v670_v27 }
 0x2d0   : > { %v661_v37 = vpop.xlane.xlu0 %660 }
 0x2d1   : > { %982 = vrsqrt.f32 %v717_v55  ;;  %v718_v59 = vadd.f32 1e-05, %v702_v58  ;;  %v699_v62 = vmul.f32 0.03125, %v661_v37 }
 0x2d2   : > { %v664_v42 = vpop.xlane.xlu1 %663 }
 0x2d3   : > { %984 = vrsqrt.f32 %v718_v59  ;;  %v715_v2 = vadd.f32 1e-05, %v699_v62  ;;  %v700_v6 = vmul.f32 0.03125, %v664_v42 }
 0x2d4   : > { %v975_v50 = vpop.eup %974  ;;  %v679_v63 = vpop.xlane.xlu0 %678 }
 0x2d5   : > { %v745_v57 = vmul.f32 %v975_v50, %v1228_v41  ;;  %986 = vrsqrt.f32 %v715_v2  ;;  %v716_v29 = vadd.f32 1e-05, %v700_v6  ;;  %v705_v28 = vmul.f32 0.03125, %v679_v63 }
 0x2d6   : > { %v682_v32 = vpop.xlane.xlu1 %681 }
 0x2d7   : > { %v765_v7 = vmul.f32 %v1341_v45, %v745_v57  ;;  %988 = vrsqrt.f32 %v716_v29  ;;  %v721_v10 = vadd.f32 1e-05, %v705_v28  ;;  %v706_v35 = vmul.f32 0.03125, %v682_v32 }
 0x2d8   : > { %v977_v60 = vpop.eup %976  ;;  %v673_v31 = vpop.xlane.xlu0 %672 }
 0x2d9   : > { %v979_v61 = vpop.eup %978  ;;  %v785_v41 = vadd.f32 %v1344_v52, %v765_v7  ;;  %v746_v36 = vmul.f32 %v977_v60, %v1238_v56  ;;  %990 = vrsqrt.f32 %v721_v10  ;;  %v722_v39 = vadd.f32 1e-05, %v706_v35 }
 0x2da   : > { %v743_v0 = vmul.f32 %v979_v61, %v1232_v46  ;;  %v703_v1 = vmul.f32 0.03125, %v673_v31  ;;  %v676_v43 = vpop.xlane.xlu1 %675 }
 0x2db   : > { %801 = vst.msk [vmem:[%s1353_s8 + $0x10] sm:$0xff] %vm247_vm0, %v785_v41  ;;  %v766_v24 = vmul.f32 %v1341_v45, %v746_v36  ;;  %992 = vrsqrt.f32 %v722_v39  ;;  %v704_v13 = vmul.f32 0.03125, %v676_v43 }
 0x2dc   : > { %v981_v20 = vpop.eup %980  ;;  %v763_v3 = vmul.f32 %v1341_v45, %v743_v0  ;;  %v719_v8 = vadd.f32 1e-05, %v703_v1  ;;  %v685_v9 = vpop.xlane.xlu0 %684 }
 0x2dd   : > { %v786_v56 = vadd.f32 %v1344_v52, %v766_v24  ;;  %v744_v11 = vmul.f32 %v981_v20, %v1245_v33  ;;  %v720_v46 = vadd.f32 1e-05, %v704_v13  ;;  %v707_v12 = vmul.f32 0.03125, %v685_v9 }
 0x2de   : > { %v983_v44 = vpop.eup %982  ;;  %v783_v21 = vadd.f32 %v1344_v52, %v763_v3  ;;  %994 = vrsqrt.f32 %v719_v8 }
 0x2df   : > { %802 = vst.msk [vmem:[%s1353_s8 + $0x18] sm:$0xff] %vm247_vm0, %v786_v56  ;;  %v764_v25 = vmul.f32 %v1341_v45, %v744_v11  ;;  %v749_v47 = vmul.f32 %v983_v44, %v1255_v40  ;;  %996 = vrsqrt.f32 %v720_v46  ;;  %v723_v51 = vadd.f32 1e-05, %v707_v12 }
 0x2e0   : > { %v985_v54 = vpop.eup %984  ;;  %799 = vst.msk [vmem:[%s1353_s8] sm:$0xff] %vm247_vm0, %v783_v21  ;;  %v688_v18 = vpop.xlane.xlu1 %687 }
 0x2e1   : > { %v691_v33 = vpop.xlane.xlu0 %690  ;;  %v784_v19 = vadd.f32 %v1344_v52, %v764_v25  ;;  %v769_v48 = vmul.f32 %v1341_v45, %v749_v47  ;;  %v750_v53 = vmul.f32 %v985_v54, %v1259_v4  ;;  %998 = vrsqrt.f32 %v723_v51 }
 0x2e2   : > { %v987_v27 = vpop.eup %986  ;;  %v708_v30 = vmul.f32 0.03125, %v688_v18  ;;  %v709_v55 = vmul.f32 0.03125, %v691_v33 }
 0x2e3   : > { %800 = vst.msk [vmem:[%s1353_s8 + $0x8] sm:$0xff] %vm247_vm0, %v784_v19  ;;  %v789_v40 = vadd.f32 %v1344_v52, %v769_v48  ;;  %v770_v58 = vmul.f32 %v1341_v45, %v750_v53  ;;  %v747_v34 = vmul.f32 %v987_v27, %v1266_v15 }
 0x2e4   : > { %v989_v37 = vpop.eup %988  ;;  %v724_v59 = vadd.f32 1e-05, %v708_v30  ;;  %v725_v62 = vadd.f32 1e-05, %v709_v55  ;;  %v694_v42 = vpop.xlane.xlu1 %693 }
 0x2e5   : > { %805 = vst.msk [vmem:[%s1353_s8 + $0x30] sm:$0xff] %vm247_vm0, %v789_v40  ;;  %v790_v4 = vadd.f32 %v1344_v52, %v770_v58  ;;  %v767_v2 = vmul.f32 %v1341_v45, %v747_v34  ;;  %v748_v6 = vmul.f32 %v989_v37, %v1273_v16  ;;  %v710_v50 = vmul.f32 0.03125, %v694_v42 }
 0x2e6   : > { %v991_v63 = vpop.eup %990  ;;  %1000 = vrsqrt.f32 %v724_v59 }
 0x2e7   : > { %806 = vst.msk [vmem:[%s1353_s8 + $0x38] sm:$0xff] %vm247_vm0, %v790_v4  ;;  %v787_v15 = vadd.f32 %v1344_v52, %v767_v2  ;;  %v768_v57 = vmul.f32 %v1341_v45, %v748_v6  ;;  %v753_v29 = vmul.f32 %v991_v63, %v1280_v23  ;;  %1002 = vrsqrt.f32 %v725_v62 }
 0x2e8   : > { %v993_v28 = vpop.eup %992  ;;  %v726_v32 = vadd.f32 1e-05, %v710_v50 }
 0x2e9   : > { %803 = vst.msk [vmem:[%s1353_s8 + $0x20] sm:$0xff] %vm247_vm0, %v787_v15  ;;  %v788_v16 = vadd.f32 %v1344_v52, %v768_v57  ;;  %v773_v7 = vmul.f32 %v1341_v45, %v753_v29  ;;  %v754_v10 = vmul.f32 %v993_v28, %v1287_v26 }
 0x2ea   : > { %1004 = vrsqrt.f32 %v726_v32 }
 0x2eb   : > { %v995_v35 = vpop.eup %994  ;;  %804 = vst.msk [vmem:[%s1353_s8 + $0x28] sm:$0xff] %vm247_vm0, %v788_v16  ;;  %v793_v60 = vadd.f32 %v1344_v52, %v773_v7  ;;  %v774_v23 = vmul.f32 %v1341_v45, %v754_v10 }
 0x2ec   : > { %v997_v31 = vpop.eup %996  ;;  %v751_v61 = vmul.f32 %v995_v35, %v1294_v38 }
 0x2ed   : > { %809 = vst.msk [vmem:[%s1353_s8 + $0x50] sm:$0xff] %vm247_vm0, %v793_v60  ;;  %v794_v41 = vadd.f32 %v1344_v52, %v774_v23  ;;  %v752_v26 = vmul.f32 %v997_v31, %v1301_v49 }
 0x2ee   : > { %v999_v36 = vpop.eup %998  ;;  %v771_v39 = vmul.f32 %v1341_v45, %v751_v61 }
 0x2ef   : > { %810 = vst.msk [vmem:[%s1353_s8 + $0x58] sm:$0xff] %vm247_vm0, %v794_v41  ;;  %v772_v0 = vmul.f32 %v1341_v45, %v752_v26  ;;  %v755_v1 = vmul.f32 %v999_v36, %v1308_v5 }
 0x2f0   : > { %v791_v43 = vadd.f32 %v1344_v52, %v771_v39 }
 0x2f1   : > { %v792_v38 = vadd.f32 %v1344_v52, %v772_v0  ;;  %v775_v24 = vmul.f32 %v1341_v45, %v755_v1 }
 0x2f2   : > { %807 = vst.msk [vmem:[%s1353_s8 + $0x40] sm:$0xff] %vm247_vm0, %v791_v43 }
 0x2f3   : > { %v1001_v49 = vpop.eup %1000  ;;  %808 = vst.msk [vmem:[%s1353_s8 + $0x48] sm:$0xff] %vm247_vm0, %v792_v38  ;;  %v795_v13 = vadd.f32 %v1344_v52, %v775_v24 }
 0x2f4   : > { %v1003_v20 = vpop.eup %1002  ;;  %v756_v3 = vmul.f32 %v1001_v49, %v1318_v14 }
 0x2f5   : > { %811 = vst.msk [vmem:[%s1353_s8 + $0x60] sm:$0xff] %vm247_vm0, %v795_v13  ;;  %v757_v5 = vmul.f32 %v1003_v20, %v1322_v17 }
 0x2f6   : > { %v776_v8 = vmul.f32 %v1341_v45, %v756_v3 }
 0x2f7   : > { %v1005_v9 = vpop.eup %1004  ;;  %v777_v56 = vmul.f32 %v1341_v45, %v757_v5 }
 0x2f8   : > { %v796_v11 = vadd.f32 %v1344_v52, %v776_v8  ;;  %v758_v46 = vmul.f32 %v1005_v9, %v1331_v22 }
 0x2f9   : > { %v797_v12 = vadd.f32 %v1344_v52, %v777_v56 }
 0x2fa   : > { %812 = vst.msk [vmem:[%s1353_s8 + $0x68] sm:$0xff] %vm247_vm0, %v796_v11  ;;  %v778_v44 = vmul.f32 %v1341_v45, %v758_v46 }
 0x2fb   : > { %813 = vst.msk [vmem:[%s1353_s8 + $0x70] sm:$0xff] %vm247_vm0, %v797_v12 }
 0x2fc   : > { %v798_v14 = vadd.f32 %v1344_v52, %v778_v44 }
 0x2fe   : > { %814 = vst.msk [vmem:[%s1353_s8 + $0x78] sm:$0xff] %vm247_vm0, %v798_v14 }
 0x2ff PF: > { %s14_s15 = sadd.s32 1, %s1012_s15  }
 0x300   : > { %p11_p4 = scmp.ge.s32.totalorder %s14_s15, 4  }
 0x302   :  { %13 = sbr.rel (!%p11_p4) target bundleno = 1 (0x1), region = 66 }

</bundles_post_ra>
